<compile_context>
chip_gen: v7x
topology: tpu7x:2x2x1
jax: 0.10.0
libtpu: 0.0.40
codegen_flags: <defaults>
</compile_context>

<pallas_src>
import functools

import jax
import jax.numpy as jnp
from jax.experimental import pallas as pl
from jax.experimental.pallas import tpu as pltpu


def _conv_kernel(x_ref, w_ref, o_ref, *, ksize_h, ksize_w, row_stride):
    # x_ref: (1, Cin, H*W)        per-batch image; channels on sublanes, flat
    #                             spatial axis (stride = W) on the lanes.
    # w_ref: (8, Cin*KH*KW + 1)   weights in (kh, kw, c) tap order, bias as the
    #                             last column, zero-padded to 8 output rows.
    # o_ref: (1, 8, H*W)          lane/sublane-aligned output tile -> unmasked vst.
    x = x_ref[0]                                         # (Cin, H*W)
    pieces = []
    for i in range(ksize_h):
        for j in range(ksize_w):
            s = i * row_stride + j                       # tap offset, flat coords
            pieces.append(jnp.roll(x, -s, axis=-1) if s else x)
    pieces.append(jnp.ones((1, x.shape[-1]), x.dtype))   # ones row -> folded bias
    patches = jnp.concatenate(pieces, axis=0)            # (Cin*KH*KW + 1, H*W)
    # Single fused MXU contraction (K = 28), f32 accumulate.
    # (For bit-level parity with PyTorch f32 conv, precision=HIGHEST could be
    #  passed; the default already meets the 1e-4 tolerance here.)
    out = jnp.dot(w_ref[...], patches, preferred_element_type=jnp.float32)
    o_ref[0] = out.astype(o_ref.dtype)


@jax.jit
def conv2d_pallas(x_nchw, weight_oihw, bias_o):
    """x_nchw: (N, Cin, H, W); weight: (Cout, Cin, KH, KW); bias: (Cout,).
    Returns (N, Cout, OH, OW) — same semantics as nn.Conv2d(stride=1, pad=0)."""
    N, C, H, W = x_nchw.shape
    O, _, KH, KW = weight_oihw.shape
    OH, OW = H - KH + 1, W - KW + 1
    HW = H * W
    K = C * KH * KW + 1          # +1: folded-bias row
    OP = 8                       # Cout padded up to one sublane tile

    # Free contiguous reshape: flat spatial axis (stride W) on lanes.
    x_flat = x_nchw.reshape(N, C, HW)

    # Weights in (kh, kw, c) tap order to match the in-kernel patch build,
    # bias in the last K column, zero-padded to 8 output rows.  Tiny param prep.
    w_taps = jnp.transpose(weight_oihw, (0, 2, 3, 1)).reshape(O, K - 1)
    w_pad = jnp.zeros((OP, K), x_nchw.dtype)
    w_pad = w_pad.at[:O, :K - 1].set(w_taps.astype(x_nchw.dtype))
    w_pad = w_pad.at[:O, K - 1].set(bias_o.astype(x_nchw.dtype))

    kernel = functools.partial(_conv_kernel, ksize_h=KH, ksize_w=KW, row_stride=W)

    out_pad = pl.pallas_call(
        kernel,
        grid=(N,),
        out_shape=jax.ShapeDtypeStruct((N, OP, HW), x_nchw.dtype),
        in_specs=[
            pl.BlockSpec((1, C, HW), lambda n: (n, 0, 0)),
            pl.BlockSpec((OP, K), lambda n: (0, 0)),
        ],
        out_specs=pl.BlockSpec((1, OP, HW), lambda n: (n, 0, 0)),
        compiler_params=pltpu.CompilerParams(
            dimension_semantics=("parallel",)),
    )(x_flat, w_pad)

    # Valid window: first O channels; positions p = oh*W + ow with oh<OH, ow<OW.
    return out_pad[:, :O, :].reshape(N, O, H, W)[:, :, :OH, :OW]


if __name__ == "__main__":
    key = jax.random.PRNGKey(0)
    kx, kw_key, kb_key = jax.random.split(key, 3)

    # Small shapes consistent with the module: batch=2, Cin=3, 16x16 spatial.
    N, Cin, H, W = 2, 3, 16, 16
    Cout, KH, KW = 6, 3, 3

    x = jax.random.normal(kx, (N, Cin, H, W), dtype=jnp.float32)
    # Deterministic parameter init (Kaiming-uniform-like bound, nn.Conv2d shapes).
    fan_in = Cin * KH * KW
    bound = 1.0 / jnp.sqrt(fan_in)
    weight = jax.random.uniform(kw_key, (Cout, Cin, KH, KW), jnp.float32, -bound, bound)
    bias = jax.random.uniform(kb_key, (Cout,), jnp.float32, -bound, bound)

    out = conv2d_pallas(x, weight, bias)
    out = jax.block_until_ready(out)

    # Cross-check against XLA's conv to validate semantics.
    ref = jax.lax.conv_general_dilated(
        x, weight, window_strides=(1, 1), padding="VALID",
        dimension_numbers=("NCHW", "OIHW", "NCHW"),
    ) + bias.reshape(1, Cout, 1, 1)
    assert out.shape == (N, Cout, H - KH + 1, W - KW + 1)
    assert jnp.allclose(out, ref, atol=1e-4, rtol=1e-4), float(jnp.max(jnp.abs(out - ref)))

    print("KERNEL_OK")
</pallas_src>

<mosaic_0001>
module attributes {stable_mosaic.version = 11 : i64} {
  func.func @_conv_kernel(%arg0: i32, %arg1: memref<1x3x256xf32, #tpu.memory_space<vmem>>, %arg2: memref<8x28xf32, #tpu.memory_space<vmem>>, %arg3: memref<1x8x256xf32, #tpu.memory_space<vmem>>) attributes {dimension_semantics = [#tpu.dimension_semantics<parallel>], iteration_bounds = array<i64: 2>, scalar_prefetch = 0 : i64, scratch_operands = 0 : i64, tpu.core_type = #tpu.core_type<tc>, window_params = [{transform_indices = @transform_0, window_bounds = array<i64: 1, 3, 256>}, {pipeline_mode = #tpu.pipeline_mode<synchronous>, transform_indices = @transform_1, window_bounds = array<i64: 8, 28>}, {transform_indices = @transform_2, window_bounds = array<i64: 1, 8, 256>}]} {
    %c0 = arith.constant 0 : index
    %c0_0 = arith.constant 0 : index
    %c0_1 = arith.constant 0 : index
    %0 = vector.load %arg1[%c0, %c0_0, %c0_1] : memref<1x3x256xf32, #tpu.memory_space<vmem>>, vector<1x3x256xf32>
    %1 = vector.shape_cast %0 : vector<1x3x256xf32> to vector<3x256xf32>
    %2 = vector.extract_strided_slice %1 {offsets = [0, 1], sizes = [3, 255], strides = [1, 1]} : vector<3x256xf32> to vector<3x255xf32>
    %3 = vector.extract_strided_slice %1 {offsets = [0, 0], sizes = [3, 1], strides = [1, 1]} : vector<3x256xf32> to vector<3x1xf32>
    %4 = tpu.concatenate %2, %3 in 1 : vector<3x255xf32>, vector<3x1xf32> -> vector<3x256xf32>
    %5 = vector.extract_strided_slice %1 {offsets = [0, 2], sizes = [3, 254], strides = [1, 1]} : vector<3x256xf32> to vector<3x254xf32>
    %6 = vector.extract_strided_slice %1 {offsets = [0, 0], sizes = [3, 2], strides = [1, 1]} : vector<3x256xf32> to vector<3x2xf32>
    %7 = tpu.concatenate %5, %6 in 1 : vector<3x254xf32>, vector<3x2xf32> -> vector<3x256xf32>
    %8 = vector.extract_strided_slice %1 {offsets = [0, 16], sizes = [3, 240], strides = [1, 1]} : vector<3x256xf32> to vector<3x240xf32>
    %9 = vector.extract_strided_slice %1 {offsets = [0, 0], sizes = [3, 16], strides = [1, 1]} : vector<3x256xf32> to vector<3x16xf32>
    %10 = tpu.concatenate %8, %9 in 1 : vector<3x240xf32>, vector<3x16xf32> -> vector<3x256xf32>
    %11 = vector.extract_strided_slice %1 {offsets = [0, 17], sizes = [3, 239], strides = [1, 1]} : vector<3x256xf32> to vector<3x239xf32>
    %12 = vector.extract_strided_slice %1 {offsets = [0, 0], sizes = [3, 17], strides = [1, 1]} : vector<3x256xf32> to vector<3x17xf32>
    %13 = tpu.concatenate %11, %12 in 1 : vector<3x239xf32>, vector<3x17xf32> -> vector<3x256xf32>
    %14 = vector.extract_strided_slice %1 {offsets = [0, 18], sizes = [3, 238], strides = [1, 1]} : vector<3x256xf32> to vector<3x238xf32>
    %15 = vector.extract_strided_slice %1 {offsets = [0, 0], sizes = [3, 18], strides = [1, 1]} : vector<3x256xf32> to vector<3x18xf32>
    %16 = tpu.concatenate %14, %15 in 1 : vector<3x238xf32>, vector<3x18xf32> -> vector<3x256xf32>
    %17 = vector.extract_strided_slice %1 {offsets = [0, 32], sizes = [3, 224], strides = [1, 1]} : vector<3x256xf32> to vector<3x224xf32>
    %18 = vector.extract_strided_slice %1 {offsets = [0, 0], sizes = [3, 32], strides = [1, 1]} : vector<3x256xf32> to vector<3x32xf32>
    %19 = tpu.concatenate %17, %18 in 1 : vector<3x224xf32>, vector<3x32xf32> -> vector<3x256xf32>
    %20 = vector.extract_strided_slice %1 {offsets = [0, 33], sizes = [3, 223], strides = [1, 1]} : vector<3x256xf32> to vector<3x223xf32>
    %21 = vector.extract_strided_slice %1 {offsets = [0, 0], sizes = [3, 33], strides = [1, 1]} : vector<3x256xf32> to vector<3x33xf32>
    %22 = tpu.concatenate %20, %21 in 1 : vector<3x223xf32>, vector<3x33xf32> -> vector<3x256xf32>
    %23 = vector.extract_strided_slice %1 {offsets = [0, 34], sizes = [3, 222], strides = [1, 1]} : vector<3x256xf32> to vector<3x222xf32>
    %24 = vector.extract_strided_slice %1 {offsets = [0, 0], sizes = [3, 34], strides = [1, 1]} : vector<3x256xf32> to vector<3x34xf32>
    %25 = tpu.concatenate %23, %24 in 1 : vector<3x222xf32>, vector<3x34xf32> -> vector<3x256xf32>
    %cst = arith.constant 1.000000e+00 : f32
    %26 = vector.broadcast %cst : f32 to vector<1x256xf32>
    %27 = tpu.concatenate %1, %4, %7, %10, %13, %16, %19, %22, %25, %26 in 0 : vector<3x256xf32>, vector<3x256xf32>, vector<3x256xf32>, vector<3x256xf32>, vector<3x256xf32>, vector<3x256xf32>, vector<3x256xf32>, vector<3x256xf32>, vector<3x256xf32>, vector<1x256xf32> -> vector<28x256xf32>
    %c0_2 = arith.constant 0 : index
    %c0_3 = arith.constant 0 : index
    %28 = vector.load %arg2[%c0_2, %c0_3] : memref<8x28xf32, #tpu.memory_space<vmem>>, vector<8x28xf32>
    %cst_4 = arith.constant dense<0.000000e+00> : vector<8x256xf32>
    %29 = tpu.matmul %28, %27, %cst_4 {dimension_numbers = #tpu.dot_dimension_numbers<[1], [0], [0], [1], [0, 0, 1, 1], [], []>} : vector<8x28xf32>, vector<28x256xf32>, vector<8x256xf32> -> vector<8x256xf32>
    %c0_5 = arith.constant 0 : index
    %c0_6 = arith.constant 0 : index
    %c0_7 = arith.constant 0 : index
    %30 = vector.load %arg3[%c0_5, %c0_6, %c0_7] : memref<1x8x256xf32, #tpu.memory_space<vmem>>, vector<1x8x256xf32>
    %31 = vector.shape_cast %30 : vector<1x8x256xf32> to vector<8x256xf32>
    %32 = vector.shape_cast %29 : vector<8x256xf32> to vector<1x8x256xf32>
    tpu.vector_store %arg3[%c0_5, %c0_6, %c0_7], %32 {strides = array<i32>} : memref<1x8x256xf32, #tpu.memory_space<vmem>>, vector<1x8x256xf32>,
    return
  }
  func.func @transform_0(%arg0: i32) -> (i32, i32, i32) {
    %c0_i32 = arith.constant 0 : i32
    %c0_i32_0 = arith.constant 0 : i32
    %c0_i32_1 = arith.constant 0 : i32
    return %arg0, %c0_i32, %c0_i32_0 : i32, i32, i32
  }
  func.func @transform_1(%arg0: i32) -> (i32, i32) {
    %c0_i32 = arith.constant 0 : i32
    %c0_i32_0 = arith.constant 0 : i32
    %c0_i32_1 = arith.constant 0 : i32
    return %c0_i32, %c0_i32_0 : i32, i32
  }
  func.func @transform_2(%arg0: i32) -> (i32, i32, i32) {
    %c0_i32 = arith.constant 0 : i32
    %c0_i32_0 = arith.constant 0 : i32
    %c0_i32_1 = arith.constant 0 : i32
    return %arg0, %c0_i32, %c0_i32_0 : i32, i32, i32
  }
}

</mosaic_0001>

<bundles_post_ra>
// kernel: conv2d_pallas.1
= control target key start
LH: loop header
LB: loop body
LE: loop exit
PB: predicated region body
PF: predicated region fallthrough
CT: control target
= control target key end

     0   :  { %s536_s9 = smov 0   ;;  %s599_s0 = inlined_call_operand.vmem [shape: f32[2,3,256], index: 0, kind: input, shape index: {}]   ;;  %s600_s1 = inlined_call_operand.vmem [shape: f32[8,28], index: 1, kind: input, shape index: {}]   ;;  %s601_s2 = inlined_call_operand.vmem [shape: f32[2,8,256], index: 2, kind: output, shape index: {}]  }
   0x1 LB: > { %s418_s10 = sadd.s32 4294967295, %s509_s9   ;;  %p422_p0 = scmp.ge.s32.totalorder %s509_s9, 1  ;;  %s509_s9 = sphi %s536_s9, %s12_s9  }
   0x2   : > { %p112_p1 = scmp.lt.s32.totalorder %s509_s9, 3 }
   0x4   : > { %p113_p2 = pnand %p422_p0, %p112_p1 }
   0x5   : > { %p134_p3 = scmp.lt.s32.totalorder (!%p113_p2), %s418_s10, 1  ;;  %s511_s15 = smov (!%p113_p2), 127   ;;  %v519_v3 = vmov (!%p113_p2), 0.0   ;;  %vm151_vm0 = vcmask (!%p113_p2), 1039360   ;;  %vm160_vm1 = vcmask (!%p113_p2), 1031168   ;;  %vm178_vm2 = vcmask (!%p113_p2), 908288  }
   0x6   : > { %116 = sbr.rel (%p113_p2) target bundleno = 377 (0x179), region = 28  ;;  %s512_s16 = smov (!%p113_p2), 126   ;;  %354 = vmatprep.mubr.f32.mxu0 (!%p113_p2), %v519_v3  ;;  %vm169_vm3 = vcmask (!%p113_p2), 916480   ;;  %vm196_vm4 = vcmask (!%p113_p2), 785408   ;;  %vm187_vm5 = vcmask (!%p113_p2), 900096   ;;  %vm256_vm6 = vcmask (!%p113_p2), 1042432  }
   0x7   : > { %s513_s17 = smov (!%p113_p2), 111   ;;  %s514_s18 = smov (!%p113_p2), 112   ;;  %vm271_vm7 = vcmask (!%p113_p2), 1041408   ;;  %vm259_vm8 = vcmask (!%p113_p2), 1045504   ;;  %vm205_vm9 = vcmask (!%p113_p2), 777216   ;;  %vm262_vm10 = vcmask (!%p113_p2), 1040384  }
   0x8   : > { %s515_s19 = smov (!%p113_p2), 96   ;;  %s516_s20 = smov (!%p113_p2), 110   ;;  %vm265_vm11 = vcmask (!%p113_p2), 1043456   ;;  %vm214_vm12 = vcmask (!%p113_p2), 769024   ;;  %vm268_vm13 = vcmask (!%p113_p2), 1046528   ;;  %vm274_vm14 = vcmask (!%p113_p2), 1044480  }
   0x9   : > { %s517_s21 = smov (!%p113_p2), 95   ;;  %s518_s22 = smov (!%p113_p2), 94   ;;  %vm520_vm15 = vmmov (!%p113_p2), 1  }
   0xd   : > { %s603_s10 = smov (!%p134_p3, %s418_s10), 1 }
   0xe   : > { %s432_s11 = sshll.u32 %s603_s10, 3  ;;  %s433_s25 = sshll.u32 %s603_s10, 4 }
   0xf   : > { %s138_s14 = scalar_lea.vmem %s599_s0, %s432_s11  ;;  %s143_s28 = scalar_lea.vmem %s601_s2, %s433_s25 }
  0x10   : > { %v550_v0 = vld [vmem:[%s138_s14] sm:$0x77] }
  0x11   : > { %v554_v1 = vcombine.high %v550_v0, %v550_v0 }
  0x13   : > { %v472_v2 = vpack.i.bf16 %v554_v1, %v550_v0 }
  0x15   : > { %473 = vrot.lane.b32.xlu1 %v472_v2, %s511_s15  ;;  %463 = vrot.lane.b32.xlu0 %v472_v2, %s512_s16 }
  0x19   : > { %478 = vrot.lane.b32.xlu1 %v472_v2, %s513_s17  ;;  %468 = vrot.lane.b32.xlu0 %v472_v2, %s514_s18 }
  0x1d   : > { %488 = vrot.lane.b32.xlu1 %v472_v2, %s515_s19  ;;  %483 = vrot.lane.b32.xlu0 %v472_v2, %s516_s20 }
  0x21   : > { %493 = vrot.lane.b32.xlu0 %v472_v2, %s517_s21  ;;  %498 = vrot.lane.b32.xlu1 %v472_v2, %s518_s22 }
  0x87   : > { %v474_v4 = vpop.permute.xlu1 %473  ;;  %v464_v5 = vpop.permute.xlu0 %463 }
  0x88   : > { %v476_v6 = vunpack.i.h.bf16 %v474_v4  ;;  %v475_v7 = vunpack.i.l.bf16 %v474_v4  ;;  %v466_v8 = vunpack.i.h.bf16 %v464_v5  ;;  %v465_v9 = vunpack.i.l.bf16 %v464_v5 }
  0x8a   : > { %v152_v10 = vsel %vm151_vm0, %v475_v7, %v476_v6  ;;  %v155_v11 = vsel %vm151_vm0, %v476_v6, %v475_v7  ;;  %v161_v12 = vsel %vm160_vm1, %v465_v9, %v466_v8  ;;  %v164_v13 = vsel %vm160_vm1, %v466_v8, %v465_v9  ;;  %vm439_vm0 = vmpackc.low %vm265_vm11, %vm520_vm15 }
  0x8b   : > { %v222_v14 = vrot.slane %v152_v10, 5  ;;  %v223_v15 = vrot.slane %v155_v11, 5  ;;  %v479_v16 = vpop.permute.xlu1 %478  ;;  %v469_v17 = vpop.permute.xlu0 %468  ;;  %v227_v22 = vrot.slane %v161_v12, 2  ;;  %v228_v23 = vrot.slane %v164_v13, 2 }
  0x8c   : > { %v481_v18 = vunpack.i.h.bf16 %v479_v16  ;;  %v480_v19 = vunpack.i.l.bf16 %v479_v16  ;;  %v471_v20 = vunpack.i.h.bf16 %v469_v17  ;;  %v470_v21 = vunpack.i.l.bf16 %v469_v17 }
  0x8d   : > { %v258_v32 = vsel %vm256_vm6, %v554_v1, %v223_v15  ;;  %v257_v33 = vsel %vm256_vm6, %v550_v0, %v222_v14  ;;  %v279_v14 = vld [vmem:[%s600_s1] sm:$0xff]  ;;  %vm280_vm1 = vcmask 228352  }
  0x8e   : > { %v179_v24 = vsel %vm178_vm2, %v480_v19, %v481_v18  ;;  %v182_v25 = vsel %vm178_vm2, %v481_v18, %v480_v19  ;;  %v170_v26 = vsel %vm169_vm3, %v470_v21, %v471_v20  ;;  %v173_v27 = vsel %vm169_vm3, %v471_v20, %v470_v21 }
  0x8f   : > { %v232_v28 = vrot.slane %v170_v26, 7  ;;  %v233_v29 = vrot.slane %v173_v27, 7  ;;  %v489_v30 = vpop.permute.xlu1 %488  ;;  %v484_v31 = vpop.permute.xlu0 %483  ;;  %v237_v38 = vrot.slane %v179_v24, 4  ;;  %v238_v39 = vrot.slane %v182_v25, 4 }
  0x90   : > { %v491_v34 = vunpack.i.h.bf16 %v489_v30  ;;  %v490_v35 = vunpack.i.l.bf16 %v489_v30  ;;  %v486_v36 = vunpack.i.h.bf16 %v484_v31  ;;  %v485_v37 = vunpack.i.l.bf16 %v484_v31 }
  0x91   : > { %v264_v40 = vsel %vm262_vm10, %v228_v23, %v233_v29  ;;  %v263_v41 = vsel %vm262_vm10, %v227_v22, %v232_v28  ;;  %v261_v57 = vsel %vm259_vm8, %v258_v32, %v228_v23  ;;  %v260_v59 = vsel %vm259_vm8, %v257_v33, %v227_v22 }
  0x92   : > { %v197_v42 = vsel %vm196_vm4, %v490_v35, %v491_v34  ;;  %v200_v43 = vsel %vm196_vm4, %v491_v34, %v490_v35  ;;  %v188_v44 = vsel %vm187_vm5, %v485_v37, %v486_v36  ;;  %v191_v45 = vsel %vm187_vm5, %v486_v36, %v485_v37 }
  0x93   : > { %v247_v46 = vrot.slane %v197_v42, 6  ;;  %v248_v47 = vrot.slane %v200_v43, 6  ;;  %v242_v48 = vrot.slane %v188_v44, 1  ;;  %v494_v49 = vpop.permute.xlu0 %493  ;;  %v499_v50 = vpop.permute.xlu1 %498  ;;  %v243_v51 = vrot.slane %v191_v45, 1 }
  0x94   : > { %v496_v52 = vunpack.i.h.bf16 %v494_v49  ;;  %v495_v53 = vunpack.i.l.bf16 %v494_v49  ;;  %v501_v54 = vunpack.i.h.bf16 %v499_v50  ;;  %v500_v55 = vunpack.i.l.bf16 %v499_v50 }
  0x95   : > { %v272_v56 = vsel %vm271_vm7, %v242_v48, %v247_v46  ;;  %v267_v58 = vsel %vm265_vm11, %v264_v40, %v238_v39  ;;  %v266_v3 = vsel %vm265_vm11, %v263_v41, %v237_v38  ;;  %v273_v6 = vsel %vm271_vm7, %v243_v51, %v248_v47 }
  0x96   : > { %v206_v60 = vsel %vm205_vm9, %v495_v53, %v496_v52  ;;  %v209_v61 = vsel %vm205_vm9, %v496_v52, %v495_v53  ;;  %v215_v62 = vsel %vm214_vm12, %v500_v55, %v501_v54  ;;  %v219_v63 = vsel %vm214_vm12, %v501_v54, %v500_v55 }
  0x97   : > { %v252_v0 = vrot.slane %v206_v60, 3  ;;  %v253_v1 = vrot.slane %v209_v61, 3  ;;  %v278_v2 = vsel %vm256_vm6, %v219_v63, 1.0  ;;  %v277_v4 = vsel %vm256_vm6, %v215_v62, 1.0 }
  0x98   : > { %v270_v5 = vsel %vm268_vm13, %v267_v58, %v243_v51  ;;  %v269_v7 = vsel %vm268_vm13, %v266_v3, %v242_v48 }
  0x99   : > { %v275_v8 = vsel %vm274_vm14, %v272_v56, %v252_v0  ;;  %v434_v9 = vpack.c.bf16 %v270_v5, %v261_v57  ;;  %v436_v10 = vpack.c.bf16 %v269_v7, %v260_v59  ;;  %v276_v11 = vsel %vm274_vm14, %v273_v6, %v253_v1 }
  0x9a   : > { %v438_v12 = vpack.c.bf16 %v278_v2, %v276_v11  ;;  %v441_v13 = vpack.c.bf16 %v277_v4, %v275_v8 }
  0x9b   : > { %435 = vmatprep.subr.bf16.mxu0 %v434_v9 }
  0x9c   : > { %437 = vmatpush1.bf16.msra.mxu0 %v436_v10 }
  0x9d   : > { %440 = vmatprep.subr.msk.bf16.mxu0 %vm439_vm0, %v438_v12 }
  0xa0   : > { %443 = vmatpush1.bf16.msk.msra.mxu0 %vm439_vm0, %v441_v13 }
  0xa3   : > { %429 = vmatmul.mubr.msk.f32.vlgmr.msra.gmra.mrb[0].mxu0 %vm280_vm1, %v279_v14 }
 0x176   : > { %v356_v15 = vpop.f32.mrb[0].mxu0 }
 0x177   : > { %361 = vst [vmem:[%s143_s28] sm:$0xff] %v356_v15  ;;  %v358_v16 = vpop.f32.mrb[1].mxu0 }
 0x178   : > { %362 = vst [vmem:[%s143_s28 + $0x8] sm:$0xff] %v358_v16 }
 0x179 PF: > { %s12_s9 = sadd.s32 1, %s509_s9  }
 0x17a   : > { %p9_p4 = scmp.ge.s32.totalorder %s12_s9, 4  }
 0x17c   :  { %11 = sbr.rel (!%p9_p4) target bundleno = 1 (0x1), region = 58 }

</bundles_post_ra>
